<compile_context>
chip_gen: v7x
topology: tpu7x:2x2x1
jax: 0.10.0
libtpu: 0.0.40
codegen_flags: <defaults>
</compile_context>

<pallas_src>
import jax
import jax.numpy as jnp
from jax.experimental import pallas as pl
from jax.experimental.pallas import tpu as pltpu

LANE = 128          # lane width (last-dim granularity)
SUBLANE_BF16 = 16   # bf16 sublane tile depth (second-to-last dim granularity)


def _round_up(x, m):
    return (x + m - 1) // m * m


def _cdiv(a, b):
    return (a + b - 1) // b


# ----------------------------------------------------------------------------- kernel
def mlp_kernel(x_ref, w1_ref, b1_ref, w2_ref, b2_ref, w3_ref, b3_ref,
               w4_ref, b4_ref, o_ref):
    """One (TB, Din) batch tile of x -> (TB, Dout_pad) tile of the output.

    Weights are VMEM-resident bf16 (MXU-friendly); accumulation, bias adds and
    ReLUs are f32 (safe on v5e, which has no bf16 VPU path)."""
    def dense(h_f32, w_ref, b_ref):
        acc = jnp.dot(h_f32.astype(jnp.bfloat16), w_ref[...],
                      preferred_element_type=jnp.float32)
        return acc + b_ref[...]

    h = jnp.maximum(dense(x_ref[...], w1_ref, b1_ref), 0.0)
    h = jnp.maximum(dense(h, w2_ref, b2_ref), 0.0)
    h = jnp.maximum(dense(h, w3_ref, b3_ref), 0.0)
    o_ref[...] = dense(h, w4_ref, b4_ref).astype(o_ref.dtype)


# ----------------------------------------------------------------------------- wrapper
def mlp_policy_forward(x, packed, *, output_size, block_b=1024,
                       out_dtype=jnp.bfloat16, return_padded=False):
    """x: [B, input_size].  packed: pack_params() output (bf16 weights, f32 biases).

    Returns [B, output_size] in out_dtype, or with return_padded=True the raw
    padded [B_pad, Dout_pad] slab (padded columns are exact zeros)."""
    B, Din = x.shape
    assert packed["w1"].shape[0] == Din, "x feature dim must match packed w1"
    H_p = packed["w1"].shape[1]
    Dout_p = packed["w4"].shape[1]

    # Batch tiling: TB a multiple of 16, small padding waste, and >=2 grid
    # steps whenever the batch allows it (v7x megacore; no-op on v5e/v6e).
    B16 = _round_up(max(B, 1), SUBLANE_BF16)
    cap = max(SUBLANE_BF16, _round_up(block_b, SUBLANE_BF16))
    n_tiles = _cdiv(B16, cap)
    if n_tiles == 1 and B16 >= 2 * SUBLANE_BF16:
        n_tiles = 2
    TB = _round_up(_cdiv(B16, n_tiles), SUBLANE_BF16)
    B_pad = TB * n_tiles

    # Only batch rows are padded (tiny, Din-wide copy); features stay unpadded.
    x_p = x if B_pad == B else jnp.pad(x, ((0, B_pad - B), (0, 0)))

    grid = (n_tiles,)

    def resident(a):  # whole-array block, same index every grid step (no re-DMA)
        return pl.BlockSpec(a.shape, lambda i: (0, 0))

    in_specs = [
        pl.BlockSpec((TB, Din), lambda i: (i, 0)),     # x tile, pipelined; full-extent last dim
        resident(packed["w1"]), resident(packed["b1"]),
        resident(packed["w2"]), resident(packed["b2"]),
        resident(packed["w3"]), resident(packed["b3"]),
        resident(packed["w4"]), resident(packed["b4"]),
    ]
    out_spec = pl.BlockSpec((TB, Dout_p), lambda i: (i, 0))  # 128-lane-dense vst

    out_itemsize = jnp.dtype(out_dtype).itemsize
    w_bytes = sum(int(v.size) * v.dtype.itemsize for v in packed.values())
    flops = 2 * B_pad * (Din * H_p + 2 * H_p * H_p + H_p * Dout_p)
    bytes_accessed = (x_p.size * x_p.dtype.itemsize
                      + w_bytes
                      + B_pad * Dout_p * out_itemsize)
    cost = pl.CostEstimate(flops=flops, transcendentals=0,
                           bytes_accessed=bytes_accessed)

    # VMEM budget from the real footprint (double-buffered x/out tiles,
    # double-buffered resident weights, f32+bf16 activation slabs) + headroom.
    x_tile = TB * Din * x_p.dtype.itemsize
    out_tile = TB * Dout_p * out_itemsize
    act = TB * H_p * (3 * 4 + 3 * 2)
    vmem_est = 2 * (x_tile + out_tile + w_bytes) + act
    vmem_limit = int(min(32 * 2**20, max(8 * 2**20, 4 * vmem_est)))

    out = pl.pallas_call(
        mlp_kernel,
        out_shape=jax.ShapeDtypeStruct((B_pad, Dout_p), out_dtype),
        grid=grid,
        in_specs=in_specs,
        out_specs=out_spec,
        compiler_params=pltpu.CompilerParams(
            dimension_semantics=("parallel",),   # megacore split on v7x
            vmem_limit_bytes=vmem_limit,
        ),
        cost_estimate=cost,
    )(x_p,
      packed["w1"], packed["b1"],
      packed["w2"], packed["b2"],
      packed["w3"], packed["b3"],
      packed["w4"], packed["b4"])

    if return_padded:
        return out
    return out[:B, :output_size]


# ----------------------------------------------------------------------------- params
def init_params(key, input_size, size, output_size):
    """PyTorch nn.Linear default init (uniform +/- 1/sqrt(fan_in)).
    Weights stored transposed: [in_features, out_features] (y = x @ W + b)."""
    def linear(k, fan_in, fan_out):
        kw, kb = jax.random.split(k)
        bound = 1.0 / jnp.sqrt(fan_in)
        w = jax.random.uniform(kw, (fan_in, fan_out), jnp.float32, -bound, bound)
        b = jax.random.uniform(kb, (1, fan_out), jnp.float32, -bound, bound)
        return w, b

    k1, k2, k3, k4 = jax.random.split(key, 4)
    w1, b1 = linear(k1, input_size, size)
    w2, b2 = linear(k2, size, size)
    w3, b3 = linear(k3, size, size)
    w4, b4 = linear(k4, size, output_size)
    return dict(w1=w1, b1=b1, w2=w2, b2=b2, w3=w3, b3=b3, w4=w4, b4=b4)


def pack_params(params):
    """Cast weights to bf16 and zero-pad hidden/output feature dims to 128 lanes.

    w1 keeps its true input width (the x block carries the full, unpadded
    feature dim).  Zero padding preserves the forward exactly: padded hidden
    columns stay 0 through ReLU and padded output columns are exact zeros.
    Biases stay f32 (elementwise path stays f32)."""
    def pad_w(w, pad_in=True):
        i, o = w.shape
        ip = _round_up(i, LANE) if pad_in else i
        op = _round_up(o, LANE)
        return jnp.zeros((ip, op), jnp.bfloat16).at[:i, :o].set(w.astype(jnp.bfloat16))

    def pad_b(b):
        o = b.shape[-1]
        op = _round_up(o, LANE)
        return jnp.zeros((1, op), jnp.float32).at[:, :o].set(b.reshape(1, o))

    return dict(
        w1=pad_w(params["w1"], pad_in=False), b1=pad_b(params["b1"]),
        w2=pad_w(params["w2"]), b2=pad_b(params["b2"]),
        w3=pad_w(params["w3"]), b3=pad_b(params["b3"]),
        w4=pad_w(params["w4"]), b4=pad_b(params["b4"]),
    )


# ----------------------------------------------------------------------------- references
def mlp_policy_ref_f32(x, p):
    h = jnp.maximum(x @ p["w1"] + p["b1"], 0.0)
    h = jnp.maximum(h @ p["w2"] + p["b2"], 0.0)
    h = jnp.maximum(h @ p["w3"] + p["b3"], 0.0)
    return h @ p["w4"] + p["b4"]


def mlp_policy_ref_mixed(x, packed, output_size, out_dtype=jnp.bfloat16):
    """Mirrors kernel numerics: bf16 MXU inputs, f32 accumulate, bf16 writeback."""
    def dense(h, w, b):
        return jnp.dot(h.astype(jnp.bfloat16), w,
                       preferred_element_type=jnp.float32) + b

    h = jnp.maximum(dense(x, packed["w1"], packed["b1"]), 0.0)
    h = jnp.maximum(dense(h, packed["w2"], packed["b2"]), 0.0)
    h = jnp.maximum(dense(h, packed["w3"], packed["b3"]), 0.0)
    return dense(h, packed["w4"], packed["b4"]).astype(out_dtype)[:, :output_size]


# ----------------------------------------------------------------------------- demo
if __name__ == "__main__":
    input_size, size, output_size = 16, 32, 8
    batch = 8

    key = jax.random.PRNGKey(0)
    kx, kp = jax.random.split(key)
    x = jax.random.normal(kx, (batch, input_size), jnp.float32)

    params = init_params(kp, input_size, size, output_size)
    packed = pack_params(params)

    out = mlp_policy_forward(x, packed, output_size=output_size)
    out = jax.block_until_ready(out)
    assert out.shape == (batch, output_size)
    out_f32 = out.astype(jnp.float32)

    # Exact-numerics reference (same bf16 MXU boundary / writeback, f32 accumulate).
    ref_mixed = mlp_policy_ref_mixed(x, packed, output_size).astype(jnp.float32)
    assert jnp.allclose(out_f32, ref_mixed, atol=2e-2, rtol=2e-2), \
        float(jnp.max(jnp.abs(out_f32 - ref_mixed)))

    # Full-f32 PyTorch-semantics reference (loose tol: bf16 weights + bf16 writeback).
    ref_f32 = mlp_policy_ref_f32(x, params)
    assert jnp.allclose(out_f32, ref_f32, atol=1.5e-1, rtol=1e-1), \
        float(jnp.max(jnp.abs(out_f32 - ref_f32)))

    # Larger batch exercises >1 grid step (v7x megacore path) and batch padding.
    xb = jax.random.normal(kx, (200, input_size), jnp.float32)
    outb = jax.block_until_ready(
        mlp_policy_forward(xb, packed, output_size=output_size))
    refb = mlp_policy_ref_mixed(xb, packed, output_size).astype(jnp.float32)
    assert outb.shape == (200, output_size)
    assert jnp.allclose(outb.astype(jnp.float32), refb, atol=2e-2, rtol=2e-2), \
        float(jnp.max(jnp.abs(outb.astype(jnp.float32) - refb)))

    # TODO(synk): for per-env-step rollouts, batch T steps per call (stack steps
    # on the batch axis) so launch overhead + weight DMA amortize over the rollout.
    print("KERNEL_OK")
</pallas_src>

<mosaic_0001>
module attributes {stable_mosaic.version = 11 : i64} {
  func.func @mlp_kernel(%arg0: i32, %arg1: memref<16x16xf32, #tpu.memory_space<vmem>>, %arg2: memref<16x128xbf16, #tpu.memory_space<vmem>>, %arg3: memref<1x128xf32, #tpu.memory_space<vmem>>, %arg4: memref<128x128xbf16, #tpu.memory_space<vmem>>, %arg5: memref<1x128xf32, #tpu.memory_space<vmem>>, %arg6: memref<128x128xbf16, #tpu.memory_space<vmem>>, %arg7: memref<1x128xf32, #tpu.memory_space<vmem>>, %arg8: memref<128x128xbf16, #tpu.memory_space<vmem>>, %arg9: memref<1x128xf32, #tpu.memory_space<vmem>>, %arg10: memref<16x128xbf16, #tpu.memory_space<vmem>>) attributes {dimension_semantics = [#tpu.dimension_semantics<parallel>], iteration_bounds = array<i64: 1>, scalar_prefetch = 0 : i64, scratch_operands = 0 : i64, tpu.core_type = #tpu.core_type<tc>, window_params = [{transform_indices = @transform_0, window_bounds = array<i64: 16, 16>}, {pipeline_mode = #tpu.pipeline_mode<synchronous>, transform_indices = @transform_1, window_bounds = array<i64: 16, 128>}, {pipeline_mode = #tpu.pipeline_mode<synchronous>, transform_indices = @transform_2, window_bounds = array<i64: 1, 128>}, {pipeline_mode = #tpu.pipeline_mode<synchronous>, transform_indices = @transform_3, window_bounds = array<i64: 128, 128>}, {pipeline_mode = #tpu.pipeline_mode<synchronous>, transform_indices = @transform_4, window_bounds = array<i64: 1, 128>}, {pipeline_mode = #tpu.pipeline_mode<synchronous>, transform_indices = @transform_5, window_bounds = array<i64: 128, 128>}, {pipeline_mode = #tpu.pipeline_mode<synchronous>, transform_indices = @transform_6, window_bounds = array<i64: 1, 128>}, {pipeline_mode = #tpu.pipeline_mode<synchronous>, transform_indices = @transform_7, window_bounds = array<i64: 128, 128>}, {pipeline_mode = #tpu.pipeline_mode<synchronous>, transform_indices = @transform_8, window_bounds = array<i64: 1, 128>}, {transform_indices = @transform_9, window_bounds = array<i64: 16, 128>}]} {
    %c0 = arith.constant 0 : index
    %c0_0 = arith.constant 0 : index
    %0 = vector.load %arg1[%c0, %c0_0] : memref<16x16xf32, #tpu.memory_space<vmem>>, vector<16x16xf32>
    %1 = arith.truncf %0 : vector<16x16xf32> to vector<16x16xbf16>
    %c0_1 = arith.constant 0 : index
    %c0_2 = arith.constant 0 : index
    %2 = vector.load %arg2[%c0_1, %c0_2] : memref<16x128xbf16, #tpu.memory_space<vmem>>, vector<16x128xbf16>
    %cst = arith.constant dense<0.000000e+00> : vector<16x128xf32>
    %3 = tpu.matmul %1, %2, %cst {dimension_numbers = #tpu.dot_dimension_numbers<[1], [0], [0], [1], [0, 0, 1, 1], [], []>} : vector<16x16xbf16>, vector<16x128xbf16>, vector<16x128xf32> -> vector<16x128xf32>
    %c0_3 = arith.constant 0 : index
    %c0_4 = arith.constant 0 : index
    %4 = vector.load %arg3[%c0_3, %c0_4] : memref<1x128xf32, #tpu.memory_space<vmem>>, vector<1x128xf32>
    %5 = vector.broadcast %4 : vector<1x128xf32> to vector<16x128xf32>
    %6 = arith.addf %3, %5 : vector<16x128xf32>
    %cst_5 = arith.constant 0.000000e+00 : f32
    %7 = vector.broadcast %cst_5 : f32 to vector<16x128xf32>
    %8 = arith.maximumf %6, %7 : vector<16x128xf32>
    %9 = arith.truncf %8 : vector<16x128xf32> to vector<16x128xbf16>
    %c0_6 = arith.constant 0 : index
    %c0_7 = arith.constant 0 : index
    %10 = vector.load %arg4[%c0_6, %c0_7] : memref<128x128xbf16, #tpu.memory_space<vmem>>, vector<128x128xbf16>
    %cst_8 = arith.constant dense<0.000000e+00> : vector<16x128xf32>
    %11 = tpu.matmul %9, %10, %cst_8 {dimension_numbers = #tpu.dot_dimension_numbers<[1], [0], [0], [1], [0, 0, 1, 1], [], []>} : vector<16x128xbf16>, vector<128x128xbf16>, vector<16x128xf32> -> vector<16x128xf32>
    %c0_9 = arith.constant 0 : index
    %c0_10 = arith.constant 0 : index
    %12 = vector.load %arg5[%c0_9, %c0_10] : memref<1x128xf32, #tpu.memory_space<vmem>>, vector<1x128xf32>
    %13 = vector.broadcast %12 : vector<1x128xf32> to vector<16x128xf32>
    %14 = arith.addf %11, %13 : vector<16x128xf32>
    %cst_11 = arith.constant 0.000000e+00 : f32
    %15 = vector.broadcast %cst_11 : f32 to vector<16x128xf32>
    %16 = arith.maximumf %14, %15 : vector<16x128xf32>
    %17 = arith.truncf %16 : vector<16x128xf32> to vector<16x128xbf16>
    %c0_12 = arith.constant 0 : index
    %c0_13 = arith.constant 0 : index
    %18 = vector.load %arg6[%c0_12, %c0_13] : memref<128x128xbf16, #tpu.memory_space<vmem>>, vector<128x128xbf16>
    %cst_14 = arith.constant dense<0.000000e+00> : vector<16x128xf32>
    %19 = tpu.matmul %17, %18, %cst_14 {dimension_numbers = #tpu.dot_dimension_numbers<[1], [0], [0], [1], [0, 0, 1, 1], [], []>} : vector<16x128xbf16>, vector<128x128xbf16>, vector<16x128xf32> -> vector<16x128xf32>
    %c0_15 = arith.constant 0 : index
    %c0_16 = arith.constant 0 : index
    %20 = vector.load %arg7[%c0_15, %c0_16] : memref<1x128xf32, #tpu.memory_space<vmem>>, vector<1x128xf32>
    %21 = vector.broadcast %20 : vector<1x128xf32> to vector<16x128xf32>
    %22 = arith.addf %19, %21 : vector<16x128xf32>
    %cst_17 = arith.constant 0.000000e+00 : f32
    %23 = vector.broadcast %cst_17 : f32 to vector<16x128xf32>
    %24 = arith.maximumf %22, %23 : vector<16x128xf32>
    %25 = arith.truncf %24 : vector<16x128xf32> to vector<16x128xbf16>
    %c0_18 = arith.constant 0 : index
    %c0_19 = arith.constant 0 : index
    %26 = vector.load %arg8[%c0_18, %c0_19] : memref<128x128xbf16, #tpu.memory_space<vmem>>, vector<128x128xbf16>
    %cst_20 = arith.constant dense<0.000000e+00> : vector<16x128xf32>
    %27 = tpu.matmul %25, %26, %cst_20 {dimension_numbers = #tpu.dot_dimension_numbers<[1], [0], [0], [1], [0, 0, 1, 1], [], []>} : vector<16x128xbf16>, vector<128x128xbf16>, vector<16x128xf32> -> vector<16x128xf32>
    %c0_21 = arith.constant 0 : index
    %c0_22 = arith.constant 0 : index
    %28 = vector.load %arg9[%c0_21, %c0_22] : memref<1x128xf32, #tpu.memory_space<vmem>>, vector<1x128xf32>
    %29 = vector.broadcast %28 : vector<1x128xf32> to vector<16x128xf32>
    %30 = arith.addf %27, %29 : vector<16x128xf32>
    %31 = arith.truncf %30 : vector<16x128xf32> to vector<16x128xbf16>
    %c0_23 = arith.constant 0 : index
    %c0_24 = arith.constant 0 : index
    %32 = vector.load %arg10[%c0_23, %c0_24] : memref<16x128xbf16, #tpu.memory_space<vmem>>, vector<16x128xbf16>
    tpu.vector_store %arg10[%c0_23, %c0_24], %31 {strides = array<i32>} : memref<16x128xbf16, #tpu.memory_space<vmem>>, vector<16x128xbf16>,
    return
  }
  func.func @transform_0(%arg0: i32) -> (i32, i32) {
    %c0_i32 = arith.constant 0 : i32
    %c0_i32_0 = arith.constant 0 : i32
    return %arg0, %c0_i32 : i32, i32
  }
  func.func @transform_1(%arg0: i32) -> (i32, i32) {
    %c0_i32 = arith.constant 0 : i32
    %c0_i32_0 = arith.constant 0 : i32
    %c0_i32_1 = arith.constant 0 : i32
    return %c0_i32, %c0_i32_0 : i32, i32
  }
  func.func @transform_2(%arg0: i32) -> (i32, i32) {
    %c0_i32 = arith.constant 0 : i32
    %c0_i32_0 = arith.constant 0 : i32
    %c0_i32_1 = arith.constant 0 : i32
    return %c0_i32, %c0_i32_0 : i32, i32
  }
  func.func @transform_3(%arg0: i32) -> (i32, i32) {
    %c0_i32 = arith.constant 0 : i32
    %c0_i32_0 = arith.constant 0 : i32
    %c0_i32_1 = arith.constant 0 : i32
    return %c0_i32, %c0_i32_0 : i32, i32
  }
  func.func @transform_4(%arg0: i32) -> (i32, i32) {
    %c0_i32 = arith.constant 0 : i32
    %c0_i32_0 = arith.constant 0 : i32
    %c0_i32_1 = arith.constant 0 : i32
    return %c0_i32, %c0_i32_0 : i32, i32
  }
  func.func @transform_5(%arg0: i32) -> (i32, i32) {
    %c0_i32 = arith.constant 0 : i32
    %c0_i32_0 = arith.constant 0 : i32
    %c0_i32_1 = arith.constant 0 : i32
    return %c0_i32, %c0_i32_0 : i32, i32
  }
  func.func @transform_6(%arg0: i32) -> (i32, i32) {
    %c0_i32 = arith.constant 0 : i32
    %c0_i32_0 = arith.constant 0 : i32
    %c0_i32_1 = arith.constant 0 : i32
    return %c0_i32, %c0_i32_0 : i32, i32
  }
  func.func @transform_7(%arg0: i32) -> (i32, i32) {
    %c0_i32 = arith.constant 0 : i32
    %c0_i32_0 = arith.constant 0 : i32
    %c0_i32_1 = arith.constant 0 : i32
    return %c0_i32, %c0_i32_0 : i32, i32
  }
  func.func @transform_8(%arg0: i32) -> (i32, i32) {
    %c0_i32 = arith.constant 0 : i32
    %c0_i32_0 = arith.constant 0 : i32
    %c0_i32_1 = arith.constant 0 : i32
    return %c0_i32, %c0_i32_0 : i32, i32
  }
  func.func @transform_9(%arg0: i32) -> (i32, i32) {
    %c0_i32 = arith.constant 0 : i32
    %c0_i32_0 = arith.constant 0 : i32
    return %arg0, %c0_i32 : i32, i32
  }
}

</mosaic_0001>

<bundles_post_ra>
// kernel: tpu_custom_call.1
= control target key start
LH: loop header
LB: loop body
LE: loop exit
PB: predicated region body
PF: predicated region fallthrough
CT: control target
= control target key end

     0   :  { %14 = vsyncpa [#allocation3], 0  ;;  %s1044_s0 = inlined_call_operand.hbm [shape: f32[16,16], index: 0, kind: input, shape index: {}]   ;;  %s1045_s1 = inlined_call_operand.hbm [shape: bf16[16,128], index: 1, kind: input, shape index: {}]   ;;  %s1046_s2 = inlined_call_operand.vmem [shape: f32[1,128], index: 2, kind: input, shape index: {}]   ;;  %s1047_s3 = inlined_call_operand.hbm [shape: bf16[128,128], index: 3, kind: input, shape index: {}]   ;;  %s1048_s4 = inlined_call_operand.vmem [shape: f32[1,128], index: 4, kind: input, shape index: {}]   ;;  %s1049_s5 = inlined_call_operand.hbm [shape: bf16[128,128], index: 5, kind: input, shape index: {}]   ;;  %s1050_s6 = inlined_call_operand.vmem [shape: f32[1,128], index: 6, kind: input, shape index: {}]   ;;  %s1051_s7 = inlined_call_operand.hbm [shape: bf16[128,128], index: 7, kind: input, shape index: {}]   ;;  %s1052_s8 = inlined_call_operand.vmem [shape: f32[1,128], index: 8, kind: input, shape index: {}]   ;;  %s1053_s9 = inlined_call_operand.hbm [shape: bf16[16,128], index: 9, kind: output, shape index: {}]  }
   0x1   :  { %15 = vsyncpa [#allocation6], 0 }
   0x2   :  { %16 = vsyncpa [#allocation9], 0 }
   0x3   :  { %17 = vsyncpa [#allocation4], 0  ;;  %s850_s30 = smov [#allocation5]   ;;  %s710_s13 = scalar_lea.hbm %s1045_s1, 128 }
   0x4   :  { %s35_s10 = sshll.u32 %s850_s30, 4  ;;  %p711_p0 = scmp.ne.s32.totalorder %s1045_s1, %s710_s13  ;;  %s36_s10 = int_to_ptr.vmem [resolvable:$true] %s35_s10 }
   0x5   :  { %p714_p1 = scmp.lt.u32.totalorder %s710_s13, %s1045_s1 }
   0x7   :  { %p716_p2 = pnand %p714_p1, %p711_p0 }
   0x9   :  { %719 = shalt.err (!%p716_p2)
}
   0xa   :  { %s720_s18 = scalar_lea.vmem %s36_s10, 128  ;;  %p725_p4 = scmp.lt.s32.totalorder %s36_s10, %s36_s10 }
   0xb   :  { %p721_p3 = scmp.ne.s32.totalorder %s36_s10, %s720_s18  ;;  %p726_p5 = scmp.lt.s32.totalorder %s720_s18, %s720_s18 }
   0xd   :  { %p727_p6 = por %p726_p5, %p725_p4 }
   0xf   :  { %p728_p7 = pnand %p727_p6, %p721_p3 }
  0x11   :  { %731 = shalt.err (!%p728_p7)
}
  0x12   :  { %s851_s19 = smov 64   ;;  %s852_s20 = smov 4  }
  0x13   :  { %41 = dma.hbm_to_vmem [thread:$0]  %s1045_s1, 128, %s36_s10, [#allocation6], %s851_s19, %s851_s19, %s852_s20  }
  0x14   :  { %s853_s23 = smov [#allocation8]   ;;  %s854_s25 = smov [#allocation2]  }
  0x15   :  { %s63_s24 = sshll.u32 %s853_s23, 4  ;;  %s23_s26 = sshll.u32 %s854_s25, 4  ;;  %s64_s24 = int_to_ptr.vmem [resolvable:$true] %s63_s24  ;;  %s24_s26 = int_to_ptr.vmem [resolvable:$true] %s23_s26 }
  0x16   :  { %s732_s29 = scalar_lea.hbm %s1049_s5, 1024 }
  0x17   :  { %p733_p8 = scmp.ne.s32.totalorder %s1049_s5, %s732_s29  ;;  %p736_p9 = scmp.lt.u32.totalorder %s732_s29, %s1049_s5 }
  0x19   :  { %p738_p10 = pnand %p736_p9, %p733_p8 }
  0x1b   :  { %741 = shalt.err (!%p738_p10)
}
  0x1c   :  { %s742_s1 = scalar_lea.vmem %s64_s24, 1024  ;;  %p747_p12 = scmp.lt.s32.totalorder %s64_s24, %s64_s24 }
  0x1d   :  { %p743_p11 = scmp.ne.s32.totalorder %s64_s24, %s742_s1  ;;  %p748_p13 = scmp.lt.s32.totalorder %s742_s1, %s742_s1 }
  0x1f   :  { %p749_p0 = por %p748_p13, %p747_p12 }
  0x21   :  { %p750_p1 = pnand %p749_p0, %p743_p11 }
  0x23   :  { %753 = shalt.err (!%p750_p1)
}
  0x24   :  { %69 = dma.hbm_to_vmem [thread:$0]  %s1049_s5, 1024, %s64_s24, [#allocation9], %s851_s19, %s851_s19, %s852_s20  }
  0x25   :  { %s754_s17 = scalar_lea.hbm %s1044_s0, 256 }
  0x26   :  { %p755_p2 = scmp.ne.s32.totalorder %s1044_s0, %s754_s17  ;;  %p758_p3 = scmp.lt.u32.totalorder %s754_s17, %s1044_s0 }
  0x28   :  { %p760_p4 = pnand %p758_p3, %p755_p2 }
  0x2a   :  { %763 = shalt.err (!%p760_p4)
}
  0x2b   :  { %s764_s25 = scalar_lea.vmem %s24_s26, 256  ;;  %p769_p6 = scmp.lt.s32.totalorder %s24_s26, %s24_s26 }
  0x2c   :  { %p765_p5 = scmp.ne.s32.totalorder %s24_s26, %s764_s25  ;;  %p770_p7 = scmp.lt.s32.totalorder %s764_s25, %s764_s25 }
  0x2e   :  { %p771_p8 = por %p770_p7, %p769_p6 }
  0x30   :  { %p772_p9 = pnand %p771_p8, %p765_p5 }
  0x32   :  { %775 = shalt.err (!%p772_p9)
}
  0x33   :  { %s855_s5 = smov 128   ;;  %s856_s24 = smov 8  }
  0x34   :  { %29 = dma.hbm_to_vmem [thread:$0]  %s1044_s0, 256, %s24_s26, [#allocation3], %s855_s5, %s855_s5, %s856_s24  }
  0x35   :  { %s857_s29 = smov [#allocation7]   ;;  %s858_s11 = smov [#allocation10]  }
  0x36   :  { %s49_s30 = sshll.u32 %s857_s29, 4  ;;  %s77_s12 = sshll.u32 %s858_s11, 4  ;;  %s50_s30 = int_to_ptr.vmem [resolvable:$true] %s49_s30  ;;  %s78_s12 = int_to_ptr.vmem [resolvable:$true] %s77_s12 }
  0x37   :  { %s776_s10 = scalar_lea.hbm %s1047_s3, 1024 }
  0x38   :  { %p777_p10 = scmp.ne.s32.totalorder %s1047_s3, %s776_s10  ;;  %p780_p11 = scmp.lt.u32.totalorder %s776_s10, %s1047_s3 }
  0x3a   :  { %p782_p12 = pnand %p780_p11, %p777_p10 }
  0x3c   :  { %785 = shalt.err (!%p782_p12)
}
  0x3d   :  { %s786_s0 = scalar_lea.vmem %s50_s30, 1024  ;;  %p791_p0 = scmp.lt.s32.totalorder %s50_s30, %s50_s30 }
  0x3e   :  { %p787_p13 = scmp.ne.s32.totalorder %s50_s30, %s786_s0  ;;  %p792_p1 = scmp.lt.s32.totalorder %s786_s0, %s786_s0 }
  0x40   :  { %p793_p2 = por %p792_p1, %p791_p0 }
  0x42   :  { %p794_p3 = pnand %p793_p2, %p787_p13 }
  0x44   :  { %797 = shalt.err (!%p794_p3)
}
  0x45   :  { %55 = dma.hbm_to_vmem [thread:$0]  %s1047_s3, 1024, %s50_s30, [#allocation6], %s851_s19, %s851_s19, %s852_s20  }
  0x46   :  { %s798_s23 = scalar_lea.hbm %s1051_s7, 1024 }
  0x47   :  { %p799_p4 = scmp.ne.s32.totalorder %s1051_s7, %s798_s23  ;;  %p802_p5 = scmp.lt.u32.totalorder %s798_s23, %s1051_s7 }
  0x49   :  { %p804_p6 = pnand %p802_p5, %p799_p4 }
  0x4b   :  { %807 = shalt.err (!%p804_p6)
}
  0x4c   :  { %s808_s28 = scalar_lea.vmem %s78_s12, 1024  ;;  %p813_p8 = scmp.lt.s32.totalorder %s78_s12, %s78_s12 }
  0x4d   :  { %p809_p7 = scmp.ne.s32.totalorder %s78_s12, %s808_s28  ;;  %p814_p9 = scmp.lt.s32.totalorder %s808_s28, %s808_s28 }
  0x4f   :  { %p815_p10 = por %p814_p9, %p813_p8 }
  0x51   :  { %p816_p11 = pnand %p815_p10, %p809_p7 }
  0x53   :  { %819 = shalt.err (!%p816_p11)
}
  0x54   :  { %83 = dma.hbm_to_vmem [thread:$0]  %s1051_s7, 1024, %s78_s12, [#allocation9], %s851_s19, %s851_s19, %s852_s20  }
  0x55   :  { %842 = dma.done.wait [#allocation3], 256  }
  0x56   :  { %843 = vsyncadd [#allocation3], 4294967040 }
  0x57   :  { %844 = dma.done.wait [#allocation6], 1152  }
  0x58   :  { %845 = vsyncadd [#allocation6], 4294966144 }
  0x59   :  { %846 = dma.done.wait [#allocation9], 2048  }
  0x5a   :  { %847 = vsyncadd [#allocation9], 4294965248  ;;  %v859_v0 = vmov 0.0   ;;  %vm860_vm0 = vmmov 0   ;;  %v685_v1 = vld [vmem:[#allocation5] sm:$0xff]   ;;  %v102_v2 = vld [vmem:[#allocation2] sm:$0xff] }
  0x5b   :  { %607 = vmatprep.subr.bf16.mxu0 %v859_v0  ;;  %609 = vmatprep.mubr.msk.bf16.mxu0 %vm860_vm0, %v859_v0  ;;  %v103_v3 = vld [vmem:[#allocation2 + $0x8] sm:$0xff]  ;;  %vm120_vm1 = vcmask 130048   ;;  %v686_v5 = vld [vmem:[#allocation7] sm:$0xff]   ;;  %v687_v6 = vld [vmem:[#allocation7 + $0x8] sm:$0xff]   ;;  %s861_s10 = smov [#allocation11]  }
  0x5c   :  { %613 = vmatprep.subr.bf16.mxu1 %v859_v0  ;;  %629 = vmatprep.mubr.msk.bf16.mxu1 %vm860_vm0, %v859_v0  ;;  %v104_v4 = vpack.c.bf16 %v103_v3, %v102_v2  ;;  %v688_v7 = vld [vmem:[#allocation7 + $0x10] sm:$0xff]   ;;  %v689_v8 = vld [vmem:[#allocation7 + $0x18] sm:$0xff]   ;;  %v690_v9 = vld [vmem:[#allocation7 + $0x20] sm:$0xff]   ;;  %s525_s14 = sshll.u32 %s861_s10, 4  ;;  %s526_s14 = int_to_ptr.vmem [resolvable:$true] %s525_s14 }
  0x5d   :  { %608 = vmatpush3.bf16.msra.mxu0 %v685_v1  ;;  %614 = vmatpush3.bf16.msra.mxu1 %v686_v5  ;;  %v691_v10 = vld [vmem:[#allocation7 + $0x28] sm:$0xff]   ;;  %v692_v11 = vld [vmem:[#allocation7 + $0x30] sm:$0xff]   ;;  %v693_v12 = vld [vmem:[#allocation7 + $0x38] sm:$0xff]   ;;  %p825_p13 = scmp.lt.s32.totalorder %s526_s14, %s526_s14 }
  0x5e   :  { %633 = vmatprep.subr.bf16.mxu0 %v859_v0  ;;  %615 = vmatprep.subr.bf16.mxu1 %v859_v0  ;;  %v694_v13 = vld [vmem:[#allocation8] sm:$0xff]   ;;  %v695_v14 = vld [vmem:[#allocation8 + $0x8] sm:$0xff]   ;;  %v696_v15 = vld [vmem:[#allocation8 + $0x10] sm:$0xff]  }
  0x5f   :  { %v697_v16 = vld [vmem:[#allocation8 + $0x18] sm:$0xff]   ;;  %v698_v17 = vld [vmem:[#allocation8 + $0x20] sm:$0xff]   ;;  %v699_v18 = vld [vmem:[#allocation8 + $0x28] sm:$0xff]  }
  0x60   :  { %610 = vmatmul.mubr.msk.bf16.vlgmr.msra.gmra.mrb[0].mxu0 %vm120_vm1, %v104_v4  ;;  %v539_v19 = vld [vmem:[%s1046_s2] ss:$0 sm:$0xff]  ;;  %v700_v29 = vld [vmem:[#allocation8 + $0x30] sm:$0xff]   ;;  %v701_v30 = vld [vmem:[#allocation8 + $0x38] sm:$0xff]  }
  0x61   :  { %649 = vmatprep.mubr.msk.bf16.mxu0 %vm860_vm0, %v859_v0  ;;  %616 = vmatpush3.bf16.msra.mxu1 %v687_v6  ;;  %v702_v31 = vld [vmem:[#allocation10] sm:$0xff]   ;;  %v703_v32 = vld [vmem:[#allocation10 + $0x8] sm:$0xff]   ;;  %v704_v33 = vld [vmem:[#allocation10 + $0x10] sm:$0xff]  }
  0x62   :  { %617 = vmatprep.subr.bf16.mxu1 %v859_v0  ;;  %634 = vmatpush3.bf16.msra.mxu0 %v694_v13  ;;  %v705_v34 = vld [vmem:[#allocation10 + $0x18] sm:$0xff]   ;;  %v706_v35 = vld [vmem:[#allocation10 + $0x20] sm:$0xff]   ;;  %v707_v36 = vld [vmem:[#allocation10 + $0x28] sm:$0xff]  }
  0x63   :  { %635 = vmatprep.subr.bf16.mxu0 %v859_v0  ;;  %v542_v37 = vld [vmem:[%s1048_s4] ss:$0 sm:$0xff]  ;;  %v708_v47 = vld [vmem:[#allocation10 + $0x30] sm:$0xff]   ;;  %v709_v48 = vld [vmem:[#allocation10 + $0x38] sm:$0xff]  }
  0x64   :  { %v551_v49 = vld [vmem:[%s1050_s6] ss:$0 sm:$0xff]  ;;  %s820_s6 = scalar_lea.vmem %s526_s14, 128 }
  0x65   :  { %618 = vmatpush3.bf16.msra.mxu1 %v688_v7  ;;  %v560_v59 = vld [vmem:[%s1052_s8] ss:$0 sm:$0xff]  ;;  %p821_p12 = scmp.ne.s32.totalorder %s526_s14, %s820_s6  ;;  %p826_p0 = scmp.lt.s32.totalorder %s820_s6, %s820_s6 }
  0x66   :  { %619 = vmatprep.subr.bf16.mxu1 %v859_v0  ;;  %636 = vmatpush3.bf16.msra.mxu0 %v695_v14 }
  0x67   :  { %637 = vmatprep.subr.bf16.mxu0 %v859_v0  ;;  %p827_p1 = por %p826_p0, %p825_p13 }
  0x69   :  { %620 = vmatpush3.bf16.msra.mxu1 %v689_v8  ;;  %p828_p2 = pnand %p827_p1, %p821_p12 }
  0x6a   :  { %621 = vmatprep.subr.bf16.mxu1 %v859_v0  ;;  %638 = vmatpush3.bf16.msra.mxu0 %v696_v15 }
  0x6b   :  { %639 = vmatprep.subr.bf16.mxu0 %v859_v0 }
  0x6d   :  { %622 = vmatpush3.bf16.msra.mxu1 %v690_v9 }
  0x6e   :  { %623 = vmatprep.subr.bf16.mxu1 %v859_v0  ;;  %640 = vmatpush3.bf16.msra.mxu0 %v697_v16 }
  0x6f   :  { %641 = vmatprep.subr.bf16.mxu0 %v859_v0 }
  0x71   :  { %624 = vmatpush3.bf16.msra.mxu1 %v691_v10 }
  0x72   :  { %625 = vmatprep.subr.bf16.mxu1 %v859_v0  ;;  %642 = vmatpush3.bf16.msra.mxu0 %v698_v17 }
  0x73   :  { %643 = vmatprep.subr.bf16.mxu0 %v859_v0 }
  0x75   :  { %626 = vmatpush3.bf16.msra.mxu1 %v692_v11 }
  0x76   :  { %627 = vmatprep.subr.bf16.mxu1 %v859_v0  ;;  %644 = vmatpush3.bf16.msra.mxu0 %v699_v18 }
  0x77   :  { %645 = vmatprep.subr.bf16.mxu0 %v859_v0 }
  0x79   :  { %628 = vmatpush3.bf16.msra.mxu1 %v693_v12 }
  0x7a   :  { %653 = vmatprep.subr.bf16.mxu1 %v859_v0  ;;  %646 = vmatpush3.bf16.msra.mxu0 %v700_v29 }
  0x7b   :  { %647 = vmatprep.subr.bf16.mxu0 %v859_v0 }
  0x7e   :  { %648 = vmatpush3.bf16.msra.mxu0 %v701_v30 }
 0x133   :  { %v158_v20 = vpop.f32.mrb[0].mxu0 }
 0x134   :  { %v159_v21 = vadd.f32 %v539_v19, %v158_v20  ;;  %v611_v22 = vpop.f32.mrb[1].mxu0 }
 0x135   :  { %v161_v23 = vpop.f32.mrb[2].mxu0 }
 0x136   :  { %v162_v24 = vadd.f32 %v539_v19, %v161_v23  ;;  %v612_v25 = vpop.f32.mrb[3].mxu0  ;;  %v165_v26 = vmax.f32 %v159_v21, 0.0 }
 0x138   :  { %v166_v27 = vmax.f32 %v162_v24, 0.0 }
 0x13a   :  { %v167_v28 = vpack.c.bf16 %v166_v27, %v165_v26 }
 0x13c   :  { %630 = vmatmul.mubr.bf16.vlgmr.msra.gmra.mrb[0].mxu1 %v167_v28 }
 0x13d   :  { %669 = vmatprep.mubr.msk.bf16.mxu1 %vm860_vm0, %v859_v0  ;;  %654 = vmatpush3.bf16.msra.mxu1 %v702_v31 }
 0x13e   :  { %655 = vmatprep.subr.bf16.mxu1 %v859_v0 }
 0x141   :  { %656 = vmatpush3.bf16.msra.mxu1 %v703_v32 }
 0x142   :  { %657 = vmatprep.subr.bf16.mxu1 %v859_v0 }
 0x145   :  { %658 = vmatpush3.bf16.msra.mxu1 %v704_v33 }
 0x146   :  { %659 = vmatprep.subr.bf16.mxu1 %v859_v0 }
 0x149   :  { %660 = vmatpush3.bf16.msra.mxu1 %v705_v34 }
 0x14a   :  { %661 = vmatprep.subr.bf16.mxu1 %v859_v0 }
 0x14d   :  { %662 = vmatpush3.bf16.msra.mxu1 %v706_v35 }
 0x14e   :  { %663 = vmatprep.subr.bf16.mxu1 %v859_v0 }
 0x151   :  { %664 = vmatpush3.bf16.msra.mxu1 %v707_v36 }
 0x152   :  { %665 = vmatprep.subr.bf16.mxu1 %v859_v0 }
 0x155   :  { %666 = vmatpush3.bf16.msra.mxu1 %v708_v47 }
 0x156   :  { %667 = vmatprep.subr.bf16.mxu1 %v859_v0 }
 0x159   :  { %668 = vmatpush3.bf16.msra.mxu1 %v709_v48 }
 0x20f   :  { %v273_v38 = vpop.f32.mrb[0].mxu1 }
 0x210   :  { %v274_v39 = vadd.f32 %v542_v37, %v273_v38  ;;  %v631_v40 = vpop.f32.mrb[1].mxu1 }
 0x211   :  { %v276_v41 = vpop.f32.mrb[2].mxu1 }
 0x212   :  { %v277_v42 = vadd.f32 %v542_v37, %v276_v41  ;;  %v632_v43 = vpop.f32.mrb[3].mxu1  ;;  %v280_v44 = vmax.f32 %v274_v39, 0.0 }
 0x214   :  { %v281_v45 = vmax.f32 %v277_v42, 0.0 }
 0x216   :  { %v282_v46 = vpack.c.bf16 %v281_v45, %v280_v44 }
 0x218   :  { %650 = vmatmul.mubr.bf16.vlgmr.msra.gmra.mrb[4].mxu0 %v282_v46 }
 0x2eb   :  { %v388_v50 = vpop.f32.mrb[4].mxu0 }
 0x2ec   :  { %v389_v51 = vadd.f32 %v551_v49, %v388_v50  ;;  %v651_v52 = vpop.f32.mrb[5].mxu0 }
 0x2ed   :  { %v391_v53 = vpop.f32.mrb[6].mxu0 }
 0x2ee   :  { %v392_v54 = vadd.f32 %v551_v49, %v391_v53  ;;  %v652_v55 = vpop.f32.mrb[7].mxu0  ;;  %v395_v56 = vmax.f32 %v389_v51, 0.0 }
 0x2f0   :  { %v396_v57 = vmax.f32 %v392_v54, 0.0 }
 0x2f2   :  { %v397_v58 = vpack.c.bf16 %v396_v57, %v395_v56 }
 0x2f4   :  { %670 = vmatmul.mubr.bf16.vlgmr.msra.gmra.mrb[4].mxu1 %v397_v58 }
 0x3c7   :  { %v503_v60 = vpop.f32.mrb[4].mxu1 }
 0x3c8   :  { %v671_v61 = vpop.f32.mrb[5].mxu1  ;;  %v504_v63 = vadd.f32 %v560_v59, %v503_v60 }
 0x3c9   :  { %v506_v62 = vpop.f32.mrb[6].mxu1 }
 0x3ca   :  { %v507_v0 = vadd.f32 %v560_v59, %v506_v62  ;;  %v672_v1 = vpop.f32.mrb[7].mxu1 }
 0x3cc   :  { %v576_v2 = vpack.c.bf16 %v507_v0, %v504_v63 }
 0x3ce   :  { %577 = vst [vmem:[#allocation11] sm:$0xff] %v576_v2  }
 0x3cf   :  { %831 = shalt.err (!%p828_p2)
}
 0x3d0   :  { %s832_s16 = scalar_lea.hbm %s1053_s9, 128 }
 0x3d1   :  { %p833_p3 = scmp.ne.s32.totalorder %s1053_s9, %s832_s16  ;;  %p836_p4 = scmp.lt.u32.totalorder %s832_s16, %s1053_s9 }
 0x3d3   :  { %p838_p5 = pnand %p836_p4, %p833_p3 }
 0x3d5   :  { %841 = shalt.err (!%p838_p5)
}
 0x3d6   :  { %531 = dma.vmem_to_hbm [thread:$0]  %s526_s14, 128, %s1053_s9, [#allocation4], %s851_s19, %s851_s19, %s852_s20  }
 0x3d7   :  { %848 = dma.done.wait [#allocation4], 128  }
 0x3d8   :  { %849 = vsyncadd [#allocation4], 4294967168 }
 0x3d9   :  { %535 = vsyncpa [#allocation3], 1 }
 0x3da   :  { %536 = vsyncpa [#allocation6], 1 }
 0x3db   :  { %537 = vsyncpa [#allocation9], 1 }
 0x3dc   :  { %538 = vsyncpa [#allocation4], 1 }

</bundles_post_ra>
